<compile_context>
chip_gen: v5e
topology: v5e:2x2
jax: 0.10.0
libtpu: 0.0.40
codegen_flags: <defaults>
</compile_context>

<pallas_src>
import jax
import jax.numpy as jnp
from jax.experimental import pallas as pl
from jax.experimental.pallas import tpu as pltpu


def _round_up(x, m):
    return ((x + m - 1) // m) * m


def critic_kernel(h_ref, w_in_ref, b_in_ref, w2_ref, b2_ref, w3_ref, b3_ref,
                  q_ref):
    # Layer 1: fused fc1 + fc12.  bf16 operands, f32 accumulation on the MXU.
    h = h_ref[...].astype(jnp.bfloat16)
    out1 = jnp.dot(h, w_in_ref[...], preferred_element_type=jnp.float32)
    out1 = jnp.maximum(out1 + b_in_ref[...], 0.0).astype(jnp.bfloat16)

    # Layer 2: fc2 + ReLU (the dominant matmul: tile_b x 512 x 512).
    out2 = jnp.dot(out1, w2_ref[...], preferred_element_type=jnp.float32)
    out2 = jnp.maximum(out2 + b2_ref[...], 0.0)

    # Layer 3 (out_features = 1): VPU multiply + XLU lane reduction keeps the
    # MXU free and avoids a 1-useful-lane matmul.
    q = jnp.sum(out2 * w3_ref[...], axis=-1, keepdims=True) + b3_ref[...]
    q_ref[...] = q.astype(q_ref.dtype)


def critic_forward(x, wa, a, prep, *, tile_b=None):
    """x: (B, state_dim), wa: (B, n_buses-1), a: (B, 1)  ->  Q: (B, 1)."""
    # Single wrapper-side concat; with the statically fused weight it exactly
    # reproduces fc1(cat([x, a])) + fc12(wa).
    h = jnp.concatenate([x, a, wa], axis=1)
    B, K = h.shape
    Hp = prep["w2"].shape[0]

    if tile_b is None:
        tile_b = min(256, _round_up(B, 8))      # sublane-aligned batch tile
    Bp = _round_up(B, tile_b)
    if Bp != B:
        h = jnp.pad(h, ((0, Bp - B), (0, 0)))   # padded rows sliced off below

    grid = (Bp // tile_b,)

    def full(arr):
        # Whole-array block, constant block index -> fetched once, VMEM-resident.
        return pl.BlockSpec(arr.shape, lambda i: (0, 0))

    # Advisory cost hint so XLA schedules neighbours around the custom call.
    flops = 2 * Bp * (K * Hp + Hp * Hp + Hp)
    bytes_accessed = (
        h.size * 4 + Bp * 4                               # activations in/out
        + (prep["w_in"].size + prep["w2"].size) * 2       # bf16 weights
        + (prep["b_in"].size + prep["b2"].size + prep["w3"].size + 1) * 4)

    q = pl.pallas_call(
        critic_kernel,
        out_shape=jax.ShapeDtypeStruct((Bp, 1), jnp.float32),
        grid_spec=pltpu.PrefetchScalarGridSpec(
            num_scalar_prefetch=0,
            grid=grid,
            in_specs=[
                pl.BlockSpec((tile_b, K), lambda i: (i, 0)),   # activations
                full(prep["w_in"]), full(prep["b_in"]),
                full(prep["w2"]), full(prep["b2"]),
                full(prep["w3"]), full(prep["b3"]),
            ],
            out_specs=pl.BlockSpec((tile_b, 1), lambda i: (i, 0)),
        ),
        compiler_params=pltpu.CompilerParams(
            dimension_semantics=("parallel",)),  # batch tiles -> v7x 2 TCs
        cost_estimate=pl.CostEstimate(
            flops=flops, transcendentals=0, bytes_accessed=bytes_accessed),
    )(h, prep["w_in"], prep["b_in"], prep["w2"], prep["b2"],
      prep["w3"], prep["b3"])
    return q[:B]


def init_critic_params(key, state_dim, n_buses, hidden1=400):
    """PyTorch nn.Linear-like init (U[-1/sqrt(fan_in), +1/sqrt(fan_in)]).
    Weights stored pre-transposed as (in_features, out_features), float32."""
    def linear(key, fan_in, fan_out):
        kw, kb = jax.random.split(key)
        bound = float(max(fan_in, 1)) ** -0.5
        w = jax.random.uniform(kw, (fan_in, fan_out), jnp.float32, -bound, bound)
        b = jax.random.uniform(kb, (1, fan_out), jnp.float32, -bound, bound)
        return w, b

    k1, k12, k2, k3 = jax.random.split(key, 4)
    w1, b1 = linear(k1, state_dim + 1, hidden1)    # fc1 on cat([x, a])
    w12, b12 = linear(k12, n_buses - 1, hidden1)   # fc12 on wa
    w2, b2 = linear(k2, hidden1, hidden1)          # fc2
    w3, b3 = linear(k3, hidden1, 1)                # fc3
    return dict(w1=w1, b1=b1, w12=w12, b12=b12, w2=w2, b2=b2, w3=w3, b3=b3)


def prepare_critic_params(p, lane=128):
    """One-time static transform: fuse fc1+fc12, zero-pad hidden 400 -> 512
    (exact), cast matmul weights to bf16, biases stay f32."""
    H = p["w2"].shape[0]
    Hp = _round_up(H, lane)
    padc = ((0, 0), (0, Hp - H))
    w_in = jnp.pad(jnp.concatenate([p["w1"], p["w12"]], axis=0), padc)
    w2 = jnp.pad(p["w2"], ((0, Hp - H), (0, Hp - H)))
    return dict(
        w_in=w_in.astype(jnp.bfloat16),
        b_in=jnp.pad(p["b1"] + p["b12"], padc),   # exact pre-sum, f32
        w2=w2.astype(jnp.bfloat16),
        b2=jnp.pad(p["b2"], padc),                # f32
        w3=jnp.pad(p["w3"].T, padc),              # (1, Hp) f32 row for VPU fc3
        b3=p["b3"],                               # (1, 1) f32
    )


def critic_reference_f32(x, wa, a, p):
    """Pure-JAX f32 reference of the original PyTorch forward."""
    h1 = jnp.concatenate([x, a], axis=1)
    out1 = h1 @ p["w1"] + p["b1"] + wa @ p["w12"] + p["b12"]
    out1 = jnp.maximum(out1, 0.0)
    out2 = jnp.maximum(out1 @ p["w2"] + p["b2"], 0.0)
    return out2 @ p["w3"] + p["b3"]


def critic_reference_prepared(x, wa, a, pp):
    """Pure-JAX reference using the SAME fused/padded/bf16 params the kernel
    uses (isolates kernel-level bugs from quantization error)."""
    h = jnp.concatenate([x, a, wa], axis=1).astype(jnp.bfloat16)
    out1 = jnp.dot(h, pp["w_in"], preferred_element_type=jnp.float32) + pp["b_in"]
    out1 = jnp.maximum(out1, 0.0).astype(jnp.bfloat16)
    out2 = jnp.dot(out1, pp["w2"], preferred_element_type=jnp.float32) + pp["b2"]
    out2 = jnp.maximum(out2, 0.0)
    return jnp.sum(out2 * pp["w3"], axis=-1, keepdims=True) + pp["b3"]


if __name__ == "__main__":
    # Small shapes consistent with the module's forward.
    batch = 8
    state_dim = 16
    n_buses = 3          # fc12 input width = n_buses - 1 = 2
    action_dim = 1

    key = jax.random.PRNGKey(0)
    kx, kwa, ka, kp = jax.random.split(key, 4)
    x = jax.random.normal(kx, (batch, state_dim), jnp.float32)
    wa = jax.random.normal(kwa, (batch, n_buses - 1), jnp.float32)
    a = jax.random.normal(ka, (batch, action_dim), jnp.float32)

    params = init_critic_params(kp, state_dim, n_buses)
    prep = prepare_critic_params(params)

    q = jax.block_until_ready(critic_forward(x, wa, a, prep))
    assert q.shape == (batch, 1)

    # Tight check vs a pure-JAX model with identical fused/padded/bf16 params
    # (isolates kernel bugs).
    q_prep = critic_reference_prepared(x, wa, a, prep)
    assert jnp.allclose(q, q_prep, atol=2e-3, rtol=2e-3), "kernel vs fused-bf16 ref"

    # Semantics check vs the original f32 forward (looser: bf16 weights).
    q_f32 = critic_reference_f32(x, wa, a, params)
    assert jnp.allclose(q, q_f32, atol=5e-2, rtol=5e-2), "kernel vs f32 reference"

    print("KERNEL_OK")
</pallas_src>

<mosaic_0001>
module attributes {stable_mosaic.version = 11 : i64} {
  func.func @critic_kernel(%arg0: i32, %arg1: memref<8x19xf32, #tpu.memory_space<vmem>>, %arg2: memref<19x512xbf16, #tpu.memory_space<vmem>>, %arg3: memref<1x512xf32, #tpu.memory_space<vmem>>, %arg4: memref<512x512xbf16, #tpu.memory_space<vmem>>, %arg5: memref<1x512xf32, #tpu.memory_space<vmem>>, %arg6: memref<1x512xf32, #tpu.memory_space<vmem>>, %arg7: memref<1x1xf32, #tpu.memory_space<vmem>>, %arg8: memref<8x1xf32, #tpu.memory_space<vmem>>) attributes {dimension_semantics = [#tpu.dimension_semantics<parallel>], iteration_bounds = array<i64: 1>, scalar_prefetch = 0 : i64, scratch_operands = 0 : i64, tpu.core_type = #tpu.core_type<tc>, window_params = [{transform_indices = @transform_0, window_bounds = array<i64: 8, 19>}, {pipeline_mode = #tpu.pipeline_mode<synchronous>, transform_indices = @transform_1, window_bounds = array<i64: 19, 512>}, {pipeline_mode = #tpu.pipeline_mode<synchronous>, transform_indices = @transform_2, window_bounds = array<i64: 1, 512>}, {pipeline_mode = #tpu.pipeline_mode<synchronous>, transform_indices = @transform_3, window_bounds = array<i64: 512, 512>}, {pipeline_mode = #tpu.pipeline_mode<synchronous>, transform_indices = @transform_4, window_bounds = array<i64: 1, 512>}, {pipeline_mode = #tpu.pipeline_mode<synchronous>, transform_indices = @transform_5, window_bounds = array<i64: 1, 512>}, {pipeline_mode = #tpu.pipeline_mode<synchronous>, transform_indices = @transform_6, window_bounds = array<i64: 1, 1>}, {transform_indices = @transform_7, window_bounds = array<i64: 8, 1>}]} {
    %c0 = arith.constant 0 : index
    %c0_0 = arith.constant 0 : index
    %0 = vector.load %arg1[%c0, %c0_0] : memref<8x19xf32, #tpu.memory_space<vmem>>, vector<8x19xf32>
    %1 = arith.truncf %0 : vector<8x19xf32> to vector<8x19xbf16>
    %c0_1 = arith.constant 0 : index
    %c0_2 = arith.constant 0 : index
    %2 = vector.load %arg2[%c0_1, %c0_2] : memref<19x512xbf16, #tpu.memory_space<vmem>>, vector<19x512xbf16>
    %cst = arith.constant dense<0.000000e+00> : vector<8x512xf32>
    %3 = tpu.matmul %1, %2, %cst {dimension_numbers = #tpu.dot_dimension_numbers<[1], [0], [0], [1], [0, 0, 1, 1], [], []>} : vector<8x19xbf16>, vector<19x512xbf16>, vector<8x512xf32> -> vector<8x512xf32>
    %c0_3 = arith.constant 0 : index
    %c0_4 = arith.constant 0 : index
    %4 = vector.load %arg3[%c0_3, %c0_4] : memref<1x512xf32, #tpu.memory_space<vmem>>, vector<1x512xf32>
    %5 = vector.broadcast %4 : vector<1x512xf32> to vector<8x512xf32>
    %6 = arith.addf %3, %5 : vector<8x512xf32>
    %cst_5 = arith.constant 0.000000e+00 : f32
    %7 = vector.broadcast %cst_5 : f32 to vector<8x512xf32>
    %8 = arith.maximumf %6, %7 : vector<8x512xf32>
    %9 = arith.truncf %8 : vector<8x512xf32> to vector<8x512xbf16>
    %c0_6 = arith.constant 0 : index
    %c0_7 = arith.constant 0 : index
    %10 = vector.load %arg4[%c0_6, %c0_7] : memref<512x512xbf16, #tpu.memory_space<vmem>>, vector<512x512xbf16>
    %cst_8 = arith.constant dense<0.000000e+00> : vector<8x512xf32>
    %11 = tpu.matmul %9, %10, %cst_8 {dimension_numbers = #tpu.dot_dimension_numbers<[1], [0], [0], [1], [0, 0, 1, 1], [], []>} : vector<8x512xbf16>, vector<512x512xbf16>, vector<8x512xf32> -> vector<8x512xf32>
    %c0_9 = arith.constant 0 : index
    %c0_10 = arith.constant 0 : index
    %12 = vector.load %arg5[%c0_9, %c0_10] : memref<1x512xf32, #tpu.memory_space<vmem>>, vector<1x512xf32>
    %13 = vector.broadcast %12 : vector<1x512xf32> to vector<8x512xf32>
    %14 = arith.addf %11, %13 : vector<8x512xf32>
    %cst_11 = arith.constant 0.000000e+00 : f32
    %15 = vector.broadcast %cst_11 : f32 to vector<8x512xf32>
    %16 = arith.maximumf %14, %15 : vector<8x512xf32>
    %c0_12 = arith.constant 0 : index
    %c0_13 = arith.constant 0 : index
    %17 = vector.load %arg6[%c0_12, %c0_13] : memref<1x512xf32, #tpu.memory_space<vmem>>, vector<1x512xf32>
    %18 = vector.broadcast %17 : vector<1x512xf32> to vector<8x512xf32>
    %19 = arith.mulf %16, %18 : vector<8x512xf32>
    %cst_14 = arith.constant dense<0.000000e+00> : vector<8xf32>
    %20 = vector.multi_reduction <add>, %19, %cst_14 [1] : vector<8x512xf32> to vector<8xf32>
    %21 = vector.shape_cast %20 : vector<8xf32> to vector<8x1xf32>
    %c0_15 = arith.constant 0 : index
    %c0_16 = arith.constant 0 : index
    %22 = vector.load %arg7[%c0_15, %c0_16] : memref<1x1xf32, #tpu.memory_space<vmem>>, vector<1x1xf32>
    %23 = vector.broadcast %22 : vector<1x1xf32> to vector<8x1xf32>
    %24 = arith.addf %21, %23 : vector<8x1xf32>
    %c0_17 = arith.constant 0 : index
    %c0_18 = arith.constant 0 : index
    %25 = vector.load %arg8[%c0_17, %c0_18] : memref<8x1xf32, #tpu.memory_space<vmem>>, vector<8x1xf32>
    tpu.vector_store %arg8[%c0_17, %c0_18], %24 {strides = array<i32>} : memref<8x1xf32, #tpu.memory_space<vmem>>, vector<8x1xf32>,
    return
  }
  func.func @transform_0(%arg0: i32) -> (i32, i32) {
    %c0_i32 = arith.constant 0 : i32
    %c0_i32_0 = arith.constant 0 : i32
    return %arg0, %c0_i32 : i32, i32
  }
  func.func @transform_1(%arg0: i32) -> (i32, i32) {
    %c0_i32 = arith.constant 0 : i32
    %c0_i32_0 = arith.constant 0 : i32
    %c0_i32_1 = arith.constant 0 : i32
    return %c0_i32, %c0_i32_0 : i32, i32
  }
  func.func @transform_2(%arg0: i32) -> (i32, i32) {
    %c0_i32 = arith.constant 0 : i32
    %c0_i32_0 = arith.constant 0 : i32
    %c0_i32_1 = arith.constant 0 : i32
    return %c0_i32, %c0_i32_0 : i32, i32
  }
  func.func @transform_3(%arg0: i32) -> (i32, i32) {
    %c0_i32 = arith.constant 0 : i32
    %c0_i32_0 = arith.constant 0 : i32
    %c0_i32_1 = arith.constant 0 : i32
    return %c0_i32, %c0_i32_0 : i32, i32
  }
  func.func @transform_4(%arg0: i32) -> (i32, i32) {
    %c0_i32 = arith.constant 0 : i32
    %c0_i32_0 = arith.constant 0 : i32
    %c0_i32_1 = arith.constant 0 : i32
    return %c0_i32, %c0_i32_0 : i32, i32
  }
  func.func @transform_5(%arg0: i32) -> (i32, i32) {
    %c0_i32 = arith.constant 0 : i32
    %c0_i32_0 = arith.constant 0 : i32
    %c0_i32_1 = arith.constant 0 : i32
    return %c0_i32, %c0_i32_0 : i32, i32
  }
  func.func @transform_6(%arg0: i32) -> (i32, i32) {
    %c0_i32 = arith.constant 0 : i32
    %c0_i32_0 = arith.constant 0 : i32
    %c0_i32_1 = arith.constant 0 : i32
    return %c0_i32, %c0_i32_0 : i32, i32
  }
  func.func @transform_7(%arg0: i32) -> (i32, i32) {
    %c0_i32 = arith.constant 0 : i32
    %c0_i32_0 = arith.constant 0 : i32
    return %arg0, %c0_i32 : i32, i32
  }
}

</mosaic_0001>

<bundles_post_ra>
// kernel: tpu_custom_call.1
= control target key start
LH: loop header
LB: loop body
LE: loop exit
PB: predicated region body
PF: predicated region fallthrough
CT: control target
= control target key end

     0   :  { %s2151_s0 = inlined_call_operand.hbm [shape: f32[8,19], index: 0, kind: input, shape index: {}]   ;;  %s2152_s1 = inlined_call_operand.hbm [shape: bf16[19,512], index: 1, kind: input, shape index: {}]   ;;  %s2153_s2 = inlined_call_operand.hbm [shape: f32[1,512], index: 2, kind: input, shape index: {}]   ;;  %s2154_s3 = inlined_call_operand.hbm [shape: bf16[512,512], index: 3, kind: input, shape index: {}]   ;;  %s2155_s4 = inlined_call_operand.vmem [shape: f32[1,512], index: 4, kind: input, shape index: {}]   ;;  %s2156_s5 = inlined_call_operand.hbm [shape: f32[1,512], index: 5, kind: input, shape index: {}]   ;;  %s2157_s6 = inlined_call_operand.<no memory space> [shape: f32[1,1], index: 6, kind: input, shape index: {}]   ;;  %s2158_s7 = inlined_call_operand.vmem [shape: f32[8,1], index: 7, kind: output, shape index: {}]  }
   0x1   :  { %v12_v0 = vstv %s2157_s6 }
   0x2   :  { %13 = vst [vmem:[#allocation2] sm:$0x1] %v12_v0 }
   0x3   :  { %14 = vsyncpa [#allocation4], 0 }
   0x4   :  { %15 = vsyncpa [#allocation6], 0  ;;  %s32_s28 = sshll.u32 %s2152_s1, 4  ;;  %s33_s28 = int_to_ptr.hbm [resolvable:$true] %s32_s28 }
   0x5   :  { %16 = vsyncpa [#allocation9], 0  ;;  %s2051_s29 = smov [#allocation5]   ;;  %s56_s10 = sshll.u32 %s2154_s3, 4  ;;  %s57_s10 = int_to_ptr.hbm [resolvable:$true] %s56_s10 }
   0x6   :  { %s34_s30 = sshll.u32 %s2051_s29, 4  ;;  %s2052_s11 = smov 256   ;;  %s35_s30 = int_to_ptr.vmem [resolvable:$true] %s34_s30 }
   0x7   :  { %s2053_s12 = smov 16   ;;  %s2054_s6 = smov [#allocation8]  }
   0x8   :  { %40 = dma.hbm_to_vmem [thread:$0]  %s33_s28, 768, %s35_s30, [#allocation6], %s2052_s11, %s2052_s11, %s2053_s12  }
   0x9   :  { %s58_s13 = sshll.u32 %s2054_s6, 4  ;;  %s22_s16 = sshll.u32 %s2151_s0, 4  ;;  %s59_s13 = int_to_ptr.vmem [resolvable:$true] %s58_s13  ;;  %s23_s16 = int_to_ptr.hbm [resolvable:$true] %s22_s16 }
   0xa   :  { %64 = dma.hbm_to_vmem [thread:$0]  %s57_s10, 16384, %s59_s13, [#allocation9], %s2052_s11, %s2052_s11, %s2053_s12  }
   0xb   :  { %s46_s18 = sshll.u32 %s2153_s2, 4  ;;  %s2055_s19 = smov [#allocation3]   ;;  %s47_s18 = int_to_ptr.hbm [resolvable:$true] %s46_s18 }
   0xc   :  { %s24_s20 = sshll.u32 %s2055_s19, 4  ;;  %s2056_s3 = smov [#allocation7]   ;;  %s25_s20 = int_to_ptr.vmem [resolvable:$true] %s24_s20 }
   0xd   :  { %27 = dma.hbm_to_vmem [thread:$0]  %s23_s16, 128, %s25_s20, [#allocation4]  }
   0xe   :  { %s48_s21 = sshll.u32 %s2056_s3, 4  ;;  %s72_s24 = sshll.u32 %s2156_s5, 4  ;;  %s49_s21 = int_to_ptr.vmem [resolvable:$true] %s48_s21  ;;  %s73_s24 = int_to_ptr.hbm [resolvable:$true] %s72_s24 }
   0xf   :  { %51 = dma.hbm_to_vmem [thread:$0]  %s47_s18, 64, %s49_s21, [#allocation6]  }
  0x10   :  { %s2057_s0 = smov [#allocation10]  }
  0x11   :  { %s74_s25 = sshll.u32 %s2057_s0, 4  ;;  %s75_s25 = int_to_ptr.vmem [resolvable:$true] %s74_s25 }
  0x12   :  { %77 = dma.hbm_to_vmem [thread:$0]  %s73_s24, 64, %s75_s25, [#allocation9]  }
  0x13   :  { %2045 = dma.done.wait [#allocation4], 128  }
  0x14   :  { %2046 = vsyncadd [#allocation4], 4294967168 }
  0x15   :  { %2047 = dma.done.wait [#allocation6], 832  }
  0x16   :  { %2048 = vsyncadd [#allocation6], 4294966464 }
  0x17   :  { %2049 = dma.done.wait [#allocation9], 16448  }
  0x18   :  { %2050 = vsyncadd [#allocation9], 4294950848  ;;  %vm153_vm0 = vcmask 1040384   ;;  %vm154_vm1 = vcmask 1041408   ;;  %v2058_v1 = vmov 65535   ;;  %v101_v32 = vld [vmem:[#allocation3] sm:$0xff] }
  0x19   :  { %v155_v2 = vsel %vm153_vm0, 4294967295, %v2058_v1  ;;  %v107_v3 = vld [vmem:[#allocation5 + $0x20] sm:$0x33]  ;;  %v108_v4 = vld [vmem:[#allocation5 + $0x28] sm:$0x33]  ;;  %v102_v42 = vpack.c.bf16 %v101_v32, %v101_v32  ;;  %vm149_vm2 = vcmask 154624  }
  0x1a   :  { %v133_v5 = vunpack.c.l.b16 %v107_v3  ;;  %v134_v6 = vunpack.c.h.b16 %v107_v3  ;;  %v135_v7 = vunpack.c.l.b16 %v108_v4  ;;  %v136_v8 = vunpack.c.h.b16 %v108_v4  ;;  %v1254_v14 = vld [vmem:[#allocation5] sm:$0xf]  ;;  %v1786_v15 = vld [vmem:[#allocation5 + $0xc] sm:$0xf0]  ;;  %v1784_v16 = vld [vmem:[#allocation5 + $0x4] sm:$0xf] }
  0x1b   :  { %v156_v9 = vsel %vm154_vm1, %v155_v2, 0  ;;  %v1256_v17 = vld [vmem:[#allocation5 + $0x10] sm:$0xf0]  ;;  %v1262_v18 = vld [vmem:[#allocation5 + $0x8] sm:$0xf]  ;;  %v1255_v30 = vor.u32 %v1786_v15, %v1254_v14  ;;  %vm1243_vm3 = vcmask 7168  }
  0x1c   :  { %v141_v10 = vpack.c.b16 %v133_v5, %v133_v5  ;;  %v142_v11 = vpack.c.b16 %v134_v6, %v134_v6  ;;  %v143_v12 = vpack.c.b16 %v135_v7, %v135_v7  ;;  %v144_v13 = vpack.c.b16 %v136_v8, %v136_v8  ;;  %v1787_v19 = vld [vmem:[#allocation5 + $0x14] sm:$0xf0]  ;;  %v1785_v24 = vld [vmem:[#allocation5 + $0xc] sm:$0xf]  ;;  %v1264_v25 = vld [vmem:[#allocation5 + $0x18] sm:$0xf0] }
  0x1d   :  { %v1386_v26 = vld [vmem:[#allocation8 + $0xe0] sm:$0xf]  ;;  %v1818_v27 = vld [vmem:[#allocation8 + $0xec] sm:$0xf0]  ;;  %v1259_v31 = vor.u32 %v1784_v16, %v1256_v17  ;;  %v1263_v33 = vor.u32 %v1787_v19, %v1262_v18  ;;  %v1267_v34 = vor.u32 %v1785_v24, %v1264_v25 }
  0x1e   :  { %v158_v20 = vand.u32 %v156_v9, %v141_v10  ;;  %v161_v21 = vand.u32 %v156_v9, %v142_v11  ;;  %v164_v22 = vand.u32 %v156_v9, %v143_v12  ;;  %v167_v23 = vand.u32 %v156_v9, %v144_v13  ;;  %v1514_v28 = vld [vmem:[#allocation8 + $0x1e0] sm:$0xf]  ;;  %v1850_v29 = vld [vmem:[#allocation8 + $0x1ec] sm:$0xf0] }
  0x1f   :  { %v1370_v35 = vld [vmem:[#allocation8 + $0xc0] sm:$0xf]  ;;  %v1387_v37 = vor.u32 %v1818_v27, %v1386_v26  ;;  %v1515_v38 = vor.u32 %v1850_v29, %v1514_v28  ;;  %v1882_v39 = vld [vmem:[#allocation8 + $0x2ec] sm:$0xf0] }
  0x20   :  { %175 = vmatpush.bf16.msra.mxu0 %v158_v20  ;;  %188 = vmatpush.bf16.msra.mxu1 %v161_v21  ;;  %v1642_v36 = vld [vmem:[#allocation8 + $0x2e0] sm:$0xf]  ;;  %v1914_v41 = vld [vmem:[#allocation8 + $0x3ec] sm:$0xf0] }
  0x21   :  { %201 = vmatpush.bf16.msra.mxu2 %v164_v22  ;;  %214 = vmatpush.bf16.msra.mxu3 %v167_v23  ;;  %v1770_v40 = vld [vmem:[#allocation8 + $0x3e0] sm:$0xf]  ;;  %v1814_v43 = vld [vmem:[#allocation8 + $0xcc] sm:$0xf0]  ;;  %v1643_v46 = vor.u32 %v1882_v39, %v1642_v36 }
  0x22   :  { %v1498_v44 = vld [vmem:[#allocation8 + $0x1c0] sm:$0xf]  ;;  %v1846_v45 = vld [vmem:[#allocation8 + $0x1cc] sm:$0xf0]  ;;  %v1771_v47 = vor.u32 %v1914_v41, %v1770_v40  ;;  %v1371_v50 = vor.u32 %v1814_v43, %v1370_v35 }
  0x23   :  { %v1354_v48 = vld [vmem:[#allocation8 + $0xa0] sm:$0xf]  ;;  %v1499_v51 = vor.u32 %v1846_v45, %v1498_v44  ;;  %v1878_v52 = vld [vmem:[#allocation8 + $0x2cc] sm:$0xf0] }
  0x24   :  { %176 = vmatpush.bf16.msra.mxu0 %v1255_v30  ;;  %189 = vmatpush.bf16.msra.mxu1 %v1259_v31  ;;  %v1626_v49 = vld [vmem:[#allocation8 + $0x2c0] sm:$0xf]  ;;  %v1910_v54 = vld [vmem:[#allocation8 + $0x3cc] sm:$0xf0] }
  0x25   :  { %202 = vmatpush.bf16.msra.mxu2 %v1263_v33  ;;  %215 = vmatpush.bf16.msra.mxu3 %v1267_v34  ;;  %v1754_v53 = vld [vmem:[#allocation8 + $0x3c0] sm:$0xf]  ;;  %v1810_v55 = vld [vmem:[#allocation8 + $0xac] sm:$0xf0]  ;;  %v1627_v58 = vor.u32 %v1878_v52, %v1626_v49 }
  0x26   :  { %v1482_v56 = vld [vmem:[#allocation8 + $0x1a0] sm:$0xf]  ;;  %v1842_v57 = vld [vmem:[#allocation8 + $0x1ac] sm:$0xf0]  ;;  %v1755_v59 = vor.u32 %v1910_v54, %v1754_v53  ;;  %v1355_v62 = vor.u32 %v1810_v55, %v1354_v48  ;;  %v1816_v54 = vld [vmem:[#allocation8 + $0xe4] sm:$0xf] }
  0x27   :  { %1268 = vmatmul.msk.bf16.vlgmr.msra.gmra.mxu0 %vm149_vm2, %v102_v42  ;;  %1269 = vmatmul.msk.bf16.vlgmr.msra.gmra.mxu1 %vm149_vm2, %v102_v42  ;;  %v1338_v60 = vld [vmem:[#allocation8 + $0x80] sm:$0xf]  ;;  %v1483_v63 = vor.u32 %v1842_v57, %v1482_v56  ;;  %v1874_v0 = vld [vmem:[#allocation8 + $0x2ac] sm:$0xf0]  ;;  %v1388_v55 = vld [vmem:[#allocation8 + $0xf0] sm:$0xf0] }
  0x28   :  { %1007 = vmatpush.bf16.msrb.mxu0 %v1387_v37  ;;  %1020 = vmatpush.bf16.msrb.mxu1 %v1515_v38  ;;  %v1610_v61 = vld [vmem:[#allocation8 + $0x2a0] sm:$0xf]  ;;  %v1906_v2 = vld [vmem:[#allocation8 + $0x3ac] sm:$0xf0]  ;;  %v1848_v56 = vld [vmem:[#allocation8 + $0x1e4] sm:$0xf] }
  0x29   :  { %1270 = vmatmul.msk.bf16.vlgmr.msra.gmra.mxu2 %vm149_vm2, %v102_v42  ;;  %1271 = vmatmul.msk.bf16.vlgmr.msra.gmra.mxu3 %vm149_vm2, %v102_v42  ;;  %v1738_v1 = vld [vmem:[#allocation8 + $0x3a0] sm:$0xf]  ;;  %v1806_v3 = vld [vmem:[#allocation8 + $0x8c] sm:$0xf0]  ;;  %v1611_v6 = vor.u32 %v1874_v0, %v1610_v61  ;;  %v1516_v57 = vld [vmem:[#allocation8 + $0x1f0] sm:$0xf0] }
  0x2a   :  { %1033 = vmatpush.bf16.msrb.mxu2 %v1643_v46  ;;  %1046 = vmatpush.bf16.msrb.mxu3 %v1771_v47  ;;  %v1466_v4 = vld [vmem:[#allocation8 + $0x180] sm:$0xf]  ;;  %v1838_v5 = vld [vmem:[#allocation8 + $0x18c] sm:$0xf0]  ;;  %v1739_v7 = vor.u32 %v1906_v2, %v1738_v1  ;;  %v1339_v10 = vor.u32 %v1806_v3, %v1338_v60  ;;  %v1812_v1 = vld [vmem:[#allocation8 + $0xc4] sm:$0xf] }
  0x2b   :  { %v1322_v8 = vld [vmem:[#allocation8 + $0x60] sm:$0xf]  ;;  %v1467_v11 = vor.u32 %v1838_v5, %v1466_v4  ;;  %v1870_v12 = vld [vmem:[#allocation8 + $0x28c] sm:$0xf0]  ;;  %v1880_v3 = vld [vmem:[#allocation8 + $0x2e4] sm:$0xf]  ;;  %v1391_v5 = vor.u32 %v1816_v54, %v1388_v55 }
  0x2c   :  { %1008 = vmatpush.bf16.msrb.mxu0 %v1371_v50  ;;  %1021 = vmatpush.bf16.msrb.mxu1 %v1499_v51  ;;  %v1594_v9 = vld [vmem:[#allocation8 + $0x280] sm:$0xf]  ;;  %v1902_v14 = vld [vmem:[#allocation8 + $0x38c] sm:$0xf0]  ;;  %v1644_v4 = vld [vmem:[#allocation8 + $0x2f0] sm:$0xf0] }
  0x2d   :  { %v1722_v13 = vld [vmem:[#allocation8 + $0x380] sm:$0xf]  ;;  %v1802_v15 = vld [vmem:[#allocation8 + $0x6c] sm:$0xf0]  ;;  %v1595_v18 = vor.u32 %v1870_v12, %v1594_v9  ;;  %v1372_v9 = vld [vmem:[#allocation8 + $0xd0] sm:$0xf0] }
  0x2e   :  { %1034 = vmatpush.bf16.msrb.mxu2 %v1627_v58  ;;  %1047 = vmatpush.bf16.msrb.mxu3 %v1755_v59  ;;  %v1450_v16 = vld [vmem:[#allocation8 + $0x160] sm:$0xf]  ;;  %v1834_v17 = vld [vmem:[#allocation8 + $0x16c] sm:$0xf0]  ;;  %v1723_v19 = vor.u32 %v1902_v14, %v1722_v13  ;;  %v1323_v22 = vor.u32 %v1802_v15, %v1322_v8  ;;  %v1772_v8 = vld [vmem:[#allocation8 + $0x3f0] sm:$0xf0]  ;;  %v1647_v14 = vor.u32 %v1880_v3, %v1644_v4 }
  0x2f   :  { %v1306_v20 = vld [vmem:[#allocation8 + $0x40] sm:$0xf]  ;;  %v1451_v23 = vor.u32 %v1834_v17, %v1450_v16  ;;  %v1866_v24 = vld [vmem:[#allocation8 + $0x26c] sm:$0xf0]  ;;  %v1808_v16 = vld [vmem:[#allocation8 + $0xa4] sm:$0xf] }
  0x30   :  { %1009 = vmatpush.bf16.msrb.mxu0 %v1355_v62  ;;  %1022 = vmatpush.bf16.msrb.mxu1 %v1483_v63  ;;  %v1578_v21 = vld [vmem:[#allocation8 + $0x260] sm:$0xf]  ;;  %v1898_v26 = vld [vmem:[#allocation8 + $0x36c] sm:$0xf0]  ;;  %v1876_v17 = vld [vmem:[#allocation8 + $0x2c4] sm:$0xf] }
  0x31   :  { %v1706_v25 = vld [vmem:[#allocation8 + $0x360] sm:$0xf]  ;;  %v1798_v27 = vld [vmem:[#allocation8 + $0x4c] sm:$0xf0]  ;;  %v1579_v30 = vor.u32 %v1866_v24, %v1578_v21  ;;  %v1908_v21 = vld [vmem:[#allocation8 + $0x3c4] sm:$0xf] }
  0x32   :  { %1035 = vmatpush.bf16.msrb.mxu2 %v1611_v6  ;;  %1048 = vmatpush.bf16.msrb.mxu3 %v1739_v7  ;;  %v1434_v28 = vld [vmem:[#allocation8 + $0x140] sm:$0xf]  ;;  %v1830_v29 = vld [vmem:[#allocation8 + $0x14c] sm:$0xf0]  ;;  %v1707_v31 = vor.u32 %v1898_v26, %v1706_v25  ;;  %v1307_v34 = vor.u32 %v1798_v27, %v1306_v20  ;;  %v1519_v6 = vor.u32 %v1848_v56, %v1516_v57  ;;  %v1912_v7 = vld [vmem:[#allocation8 + $0x3e4] sm:$0xf] }
  0x33   :  { %v1290_v32 = vld [vmem:[#allocation8 + $0x20] sm:$0xf]  ;;  %v1435_v35 = vor.u32 %v1830_v29, %v1434_v28  ;;  %v1862_v36 = vld [vmem:[#allocation8 + $0x24c] sm:$0xf0]  ;;  %v1775_v15 = vor.u32 %v1912_v7, %v1772_v8  ;;  %v1628_v20 = vld [vmem:[#allocation8 + $0x2d0] sm:$0xf0] }
  0x34   :  { %1010 = vmatpush.bf16.msrb.mxu0 %v1339_v10  ;;  %1023 = vmatpush.bf16.msrb.mxu1 %v1467_v11  ;;  %v1562_v33 = vld [vmem:[#allocation8 + $0x240] sm:$0xf]  ;;  %v1894_v38 = vld [vmem:[#allocation8 + $0x34c] sm:$0xf0]  ;;  %v1844_v10 = vld [vmem:[#allocation8 + $0x1c4] sm:$0xf]  ;;  %v1631_v26 = vor.u32 %v1876_v17, %v1628_v20 }
  0x35   :  { %v1690_v37 = vld [vmem:[#allocation8 + $0x340] sm:$0xf]  ;;  %v1794_v39 = vld [vmem:[#allocation8 + $0x2c] sm:$0xf0]  ;;  %v1563_v42 = vor.u32 %v1862_v36, %v1562_v33  ;;  %v1500_v11 = vld [vmem:[#allocation8 + $0x1d0] sm:$0xf0] }
  0x36   :  { %1036 = vmatpush.bf16.msrb.mxu2 %v1595_v18  ;;  %1049 = vmatpush.bf16.msrb.mxu3 %v1723_v19  ;;  %v1418_v40 = vld [vmem:[#allocation8 + $0x120] sm:$0xf]  ;;  %v1826_v41 = vld [vmem:[#allocation8 + $0x12c] sm:$0xf0]  ;;  %v1691_v43 = vor.u32 %v1894_v38, %v1690_v37  ;;  %v1291_v47 = vor.u32 %v1794_v39, %v1290_v32  ;;  %v1375_v18 = vor.u32 %v1812_v1, %v1372_v9  ;;  %v1840_v24 = vld [vmem:[#allocation8 + $0x1a4] sm:$0xf] }
  0x37   :  { %v1274_v44 = vld [vmem:[#allocation8] sm:$0xf]  ;;  %v1790_v45 = vld [vmem:[#allocation8 + $0xc] sm:$0xf0]  ;;  %v1419_v48 = vor.u32 %v1826_v41, %v1418_v40  ;;  %v1503_v19 = vor.u32 %v1844_v10, %v1500_v11  ;;  %v1484_v25 = vld [vmem:[#allocation8 + $0x1b0] sm:$0xf0] }
  0x38   :  { %1011 = vmatpush.bf16.msrb.mxu0 %v1323_v22  ;;  %1024 = vmatpush.bf16.msrb.mxu1 %v1451_v23  ;;  %v1546_v46 = vld [vmem:[#allocation8 + $0x220] sm:$0xf]  ;;  %v1858_v49 = vld [vmem:[#allocation8 + $0x22c] sm:$0xf0]  ;;  %v1275_v63 = vor.u32 %v1790_v45, %v1274_v44  ;;  %v1756_v22 = vld [vmem:[#allocation8 + $0x3d0] sm:$0xf0] }
  0x39   :  { %v1674_v50 = vld [vmem:[#allocation8 + $0x320] sm:$0xf]  ;;  %v1890_v51 = vld [vmem:[#allocation8 + $0x32c] sm:$0xf0]  ;;  %v1547_v58 = vor.u32 %v1858_v49, %v1546_v46  ;;  %v1356_v23 = vld [vmem:[#allocation8 + $0xb0] sm:$0xf0]  ;;  %v1759_v27 = vor.u32 %v1908_v21, %v1756_v22 }
  0x3a   :  { %1037 = vmatpush.bf16.msrb.mxu2 %v1579_v30  ;;  %1050 = vmatpush.bf16.msrb.mxu3 %v1707_v31  ;;  %v1402_v52 = vld [vmem:[#allocation8 + $0x100] sm:$0xf]  ;;  %v1822_v53 = vld [vmem:[#allocation8 + $0x10c] sm:$0xf0]  ;;  %v1675_v59 = vor.u32 %v1890_v51, %v1674_v50  ;;  %v1804_v28 = vld [vmem:[#allocation8 + $0x84] sm:$0xf]  ;;  %v1359_v30 = vor.u32 %v1808_v16, %v1356_v23  ;;  %v1487_v31 = vor.u32 %v1840_v24, %v1484_v25 }
  0x3b   :  { %v1530_v60 = vld [vmem:[#allocation8 + $0x200] sm:$0xf]  ;;  %v1854_v61 = vld [vmem:[#allocation8 + $0x20c] sm:$0xf0]  ;;  %v1403_v0 = vor.u32 %v1822_v53, %v1402_v52  ;;  %v1872_v29 = vld [vmem:[#allocation8 + $0x2a4] sm:$0xf] }
  0x3c   :  { %1012 = vmatpush.bf16.msrb.mxu0 %v1307_v34  ;;  %1025 = vmatpush.bf16.msrb.mxu1 %v1435_v35  ;;  %v1658_v62 = vld [vmem:[#allocation8 + $0x300] sm:$0xf]  ;;  %v1886_v2 = vld [vmem:[#allocation8 + $0x30c] sm:$0xf0]  ;;  %v1531_v12 = vor.u32 %v1854_v61, %v1530_v60  ;;  %v1612_v32 = vld [vmem:[#allocation8 + $0x2b0] sm:$0xf0] }
  0x3d   :  { %v1659_v13 = vor.u32 %v1886_v2, %v1658_v62  ;;  %v1904_v33 = vld [vmem:[#allocation8 + $0x3a4] sm:$0xf]  ;;  %v1740_v34 = vld [vmem:[#allocation8 + $0x3b0] sm:$0xf0]  ;;  %v1615_v38 = vor.u32 %v1872_v29, %v1612_v32  ;;  %v109_v32 = vld [vmem:[#allocation7] sm:$0xf] }
  0x3e   :  { %1038 = vmatpush.bf16.msrb.mxu2 %v1563_v42  ;;  %1051 = vmatpush.bf16.msrb.mxu3 %v1691_v43  ;;  %v1340_v35 = vld [vmem:[#allocation8 + $0x90] sm:$0xf0]  ;;  %v1836_v36 = vld [vmem:[#allocation8 + $0x184] sm:$0xf]  ;;  %v1743_v39 = vor.u32 %v1904_v33, %v1740_v34  ;;  %v111_v33 = vperm.slane %v109_v32, 0  ;;  %v112_v34 = vperm.slane %v109_v32, 1 }
  0x3f   :  { %v1468_v37 = vld [vmem:[#allocation8 + $0x190] sm:$0xf0]  ;;  %v1800_v40 = vld [vmem:[#allocation8 + $0x64] sm:$0xf]  ;;  %v1343_v42 = vor.u32 %v1804_v28, %v1340_v35 }
  0x40   :  { %1013 = vmatpush.bf16.msrb.mxu0 %v1291_v47  ;;  %1026 = vmatpush.bf16.msrb.mxu1 %v1419_v48  ;;  %v1868_v41 = vld [vmem:[#allocation8 + $0x284] sm:$0xf]  ;;  %v1471_v43 = vor.u32 %v1836_v36, %v1468_v37  ;;  %v1596_v44 = vld [vmem:[#allocation8 + $0x290] sm:$0xf0]  ;;  %v1394_v37 = vld [vmem:[#allocation8 + $0xe8] sm:$0xf] }
  0x41   :  { %v1900_v45 = vld [vmem:[#allocation8 + $0x384] sm:$0xf]  ;;  %v1724_v46 = vld [vmem:[#allocation8 + $0x390] sm:$0xf0]  ;;  %v1599_v50 = vor.u32 %v1868_v41, %v1596_v44  ;;  %v1522_v41 = vld [vmem:[#allocation8 + $0x1e8] sm:$0xf] }
  0x42   :  { %1039 = vmatpush.bf16.msrb.mxu2 %v1547_v58  ;;  %1052 = vmatpush.bf16.msrb.mxu3 %v1675_v59  ;;  %v1324_v47 = vld [vmem:[#allocation8 + $0x70] sm:$0xf0]  ;;  %v1832_v48 = vld [vmem:[#allocation8 + $0x164] sm:$0xf]  ;;  %v1727_v51 = vor.u32 %v1900_v45, %v1724_v46  ;;  %v113_v45 = vperm.slane %v109_v32, 2  ;;  %v114_v46 = vperm.slane %v109_v32, 3 }
  0x43   :  { %v1452_v49 = vld [vmem:[#allocation8 + $0x170] sm:$0xf0]  ;;  %v1327_v52 = vor.u32 %v1800_v40, %v1324_v47  ;;  %v1796_v54 = vld [vmem:[#allocation8 + $0x44] sm:$0xf]  ;;  %v1819_v40 = vld [vmem:[#allocation8 + $0xf4] sm:$0xf0] }
  0x44   :  { %1014 = vmatpush.bf16.msrb.mxu0 %v1275_v63  ;;  %1027 = vmatpush.bf16.msrb.mxu1 %v1403_v0  ;;  %v1455_v53 = vor.u32 %v1832_v48, %v1452_v49  ;;  %v1308_v55 = vld [vmem:[#allocation8 + $0x50] sm:$0xf0]  ;;  %v1828_v56 = vld [vmem:[#allocation8 + $0x144] sm:$0xf]  ;;  %v1395_v47 = vor.u32 %v1819_v40, %v1394_v37  ;;  %v1378_v49 = vld [vmem:[#allocation8 + $0xc8] sm:$0xf] }
  0x45   :  { %v1436_v57 = vld [vmem:[#allocation8 + $0x150] sm:$0xf0]  ;;  %v1311_v58 = vor.u32 %v1796_v54, %v1308_v55  ;;  %v1864_v60 = vld [vmem:[#allocation8 + $0x264] sm:$0xf]  ;;  %v1847_v54 = vld [vmem:[#allocation8 + $0x1d4] sm:$0xf0] }
  0x46   :  { %1040 = vmatpush.bf16.msrb.mxu2 %v1531_v12  ;;  %1053 = vmatpush.bf16.msrb.mxu3 %v1659_v13  ;;  %v1439_v59 = vor.u32 %v1828_v56, %v1436_v57  ;;  %v1580_v61 = vld [vmem:[#allocation8 + $0x270] sm:$0xf0]  ;;  %v1896_v62 = vld [vmem:[#allocation8 + $0x364] sm:$0xf]  ;;  %v1907_v32 = vld [vmem:[#allocation8 + $0x3b4] sm:$0xf0] }
  0x47   :  { %v1583_v63 = vor.u32 %v1864_v60, %v1580_v61  ;;  %v1708_v0 = vld [vmem:[#allocation8 + $0x370] sm:$0xf0]  ;;  %v1792_v2 = vld [vmem:[#allocation8 + $0x24] sm:$0xf]  ;;  %v1778_v60 = vld [vmem:[#allocation8 + $0x3e8] sm:$0xf] }
  0x48   :  { %1059 = vmatpush.bf16.msra.mxu0 %v1391_v5  ;;  %1072 = vmatpush.bf16.msra.mxu1 %v1519_v6  ;;  %v1711_v1 = vor.u32 %v1896_v62, %v1708_v0  ;;  %v1292_v3 = vld [vmem:[#allocation8 + $0x30] sm:$0xf0]  ;;  %v1824_v5 = vld [vmem:[#allocation8 + $0x124] sm:$0xf]  ;;  %v1871_v40 = vld [vmem:[#allocation8 + $0x294] sm:$0xf0] }
  0x49   :  { %v1295_v4 = vor.u32 %v1792_v2, %v1292_v3  ;;  %v1420_v6 = vld [vmem:[#allocation8 + $0x130] sm:$0xf0]  ;;  %v1860_v8 = vld [vmem:[#allocation8 + $0x244] sm:$0xf]  ;;  %v1915_v2 = vld [vmem:[#allocation8 + $0x3f4] sm:$0xf0] }
  0x4a   :  { %1085 = vmatpush.bf16.msra.mxu2 %v1647_v14  ;;  %1098 = vmatpush.bf16.msra.mxu3 %v1775_v15  ;;  %v1423_v7 = vor.u32 %v1824_v5, %v1420_v6  ;;  %v1564_v9 = vld [vmem:[#allocation8 + $0x250] sm:$0xf0]  ;;  %v1892_v10 = vld [vmem:[#allocation8 + $0x344] sm:$0xf]  ;;  %v1362_v3 = vld [vmem:[#allocation8 + $0xa8] sm:$0xf] }
  0x4b   :  { %v1567_v11 = vor.u32 %v1860_v8, %v1564_v9  ;;  %v1692_v12 = vld [vmem:[#allocation8 + $0x350] sm:$0xf0]  ;;  %v1788_v14 = vld [vmem:[#allocation8 + $0x4] sm:$0xf]  ;;  %v1490_v5 = vld [vmem:[#allocation8 + $0x1a8] sm:$0xf] }
  0x4c   :  { %1060 = vmatpush.bf16.msra.mxu0 %v1375_v18  ;;  %1073 = vmatpush.bf16.msra.mxu1 %v1503_v19  ;;  %v1695_v13 = vor.u32 %v1892_v10, %v1692_v12  ;;  %v1276_v15 = vld [vmem:[#allocation8 + $0x10] sm:$0xf0]  ;;  %v1820_v16 = vld [vmem:[#allocation8 + $0x104] sm:$0xf]  ;;  %v1843_v6 = vld [vmem:[#allocation8 + $0x1b4] sm:$0xf0]  ;;  %v1779_v10 = vor.u32 %v1915_v2, %v1778_v60 }
  0x4d   :  { %v1279_v17 = vor.u32 %v1788_v14, %v1276_v15  ;;  %v1404_v18 = vld [vmem:[#allocation8 + $0x110] sm:$0xf0]  ;;  %v1856_v20 = vld [vmem:[#allocation8 + $0x224] sm:$0xf]  ;;  %v1634_v12 = vld [vmem:[#allocation8 + $0x2c8] sm:$0xf] }
  0x4e   :  { %1086 = vmatpush.bf16.msra.mxu2 %v1631_v26  ;;  %1099 = vmatpush.bf16.msra.mxu3 %v1759_v27  ;;  %v1407_v19 = vor.u32 %v1820_v16, %v1404_v18  ;;  %v1548_v21 = vld [vmem:[#allocation8 + $0x230] sm:$0xf0]  ;;  %v1888_v23 = vld [vmem:[#allocation8 + $0x324] sm:$0xf]  ;;  %v1491_v16 = vor.u32 %v1843_v6, %v1490_v5  ;;  %v1911_v18 = vld [vmem:[#allocation8 + $0x3d4] sm:$0xf0] }
  0x4f   :  { %v1551_v22 = vor.u32 %v1856_v20, %v1548_v21  ;;  %v1676_v24 = vld [vmem:[#allocation8 + $0x330] sm:$0xf0]  ;;  %v1852_v26 = vld [vmem:[#allocation8 + $0x204] sm:$0xf]  ;;  %v1807_v20 = vld [vmem:[#allocation8 + $0x94] sm:$0xf0] }
  0x50   :  { %1061 = vmatpush.bf16.msra.mxu0 %v1359_v30  ;;  %1074 = vmatpush.bf16.msra.mxu1 %v1487_v31  ;;  %v1679_v25 = vor.u32 %v1888_v23, %v1676_v24  ;;  %v1532_v27 = vld [vmem:[#allocation8 + $0x210] sm:$0xf0]  ;;  %v1884_v29 = vld [vmem:[#allocation8 + $0x304] sm:$0xf]  ;;  %v1474_v21 = vld [vmem:[#allocation8 + $0x188] sm:$0xf] }
  0x51   :  { %v1535_v28 = vor.u32 %v1852_v26, %v1532_v27  ;;  %v1660_v30 = vld [vmem:[#allocation8 + $0x310] sm:$0xf0]  ;;  %v1618_v27 = vld [vmem:[#allocation8 + $0x2a8] sm:$0xf]  ;;  %v1795_v60 = vld [vmem:[#allocation8 + $0x34] sm:$0xf0] }
  0x52   :  { %1087 = vmatpush.bf16.msra.mxu2 %v1615_v38  ;;  %1100 = vmatpush.bf16.msra.mxu3 %v1743_v39  ;;  %v1663_v31 = vor.u32 %v1884_v29, %v1660_v30  ;;  %v1875_v30 = vld [vmem:[#allocation8 + $0x2b4] sm:$0xf0] }
  0x53   :  { %v1619_v37 = vor.u32 %v1875_v30, %v1618_v27  ;;  %v1863_v2 = vld [vmem:[#allocation8 + $0x254] sm:$0xf0]  ;;  %v1813_v27 = vld [vmem:[#allocation8 + $0xcc] sm:$0xf] }
  0x54   :  { %1062 = vmatpush.bf16.msra.mxu0 %v1343_v42  ;;  %1075 = vmatpush.bf16.msra.mxu1 %v1471_v43  ;;  %v1851_v42 = vld [vmem:[#allocation8 + $0x1f4] sm:$0xf0] }
  0x55   :  { %v1523_v48 = vor.u32 %v1851_v42, %v1522_v41  ;;  %v1730_v41 = vld [vmem:[#allocation8 + $0x388] sm:$0xf]  ;;  %v1903_v42 = vld [vmem:[#allocation8 + $0x394] sm:$0xf0] }
  0x56   :  { %1088 = vmatpush.bf16.msra.mxu2 %v1599_v50  ;;  %1101 = vmatpush.bf16.msra.mxu3 %v1727_v51  ;;  %v1815_v50 = vld [vmem:[#allocation8 + $0xd4] sm:$0xf0] }
  0x57   :  { %v1379_v57 = vor.u32 %v1815_v50, %v1378_v49  ;;  %v1731_v50 = vor.u32 %v1903_v42, %v1730_v41 }
  0x58   :  { %1063 = vmatpush.bf16.msra.mxu0 %v1327_v52  ;;  %1076 = vmatpush.bf16.msra.mxu1 %v1455_v53  ;;  %v1506_v53 = vld [vmem:[#allocation8 + $0x1c8] sm:$0xf] }
  0x5a   :  { %1089 = vmatpush.bf16.msra.mxu2 %v1583_v63  ;;  %1102 = vmatpush.bf16.msra.mxu3 %v1711_v1  ;;  %v1507_v1 = vor.u32 %v1847_v54, %v1506_v53  ;;  %v1586_v53 = vld [vmem:[#allocation8 + $0x268] sm:$0xf]  ;;  %v1867_v54 = vld [vmem:[#allocation8 + $0x274] sm:$0xf0] }
  0x5c   :  { %1064 = vmatpush.bf16.msra.mxu0 %v1311_v58  ;;  %1077 = vmatpush.bf16.msra.mxu1 %v1439_v59  ;;  %v1650_v58 = vld [vmem:[#allocation8 + $0x2e8] sm:$0xf]  ;;  %v1883_v59 = vld [vmem:[#allocation8 + $0x2f4] sm:$0xf0] }
  0x5d   :  { %v1651_v9 = vor.u32 %v1883_v59, %v1650_v58  ;;  %v1298_v59 = vld [vmem:[#allocation8 + $0x28] sm:$0xf] }
  0x5e   :  { %1090 = vmatpush.bf16.msra.mxu2 %v1567_v11  ;;  %1103 = vmatpush.bf16.msra.mxu3 %v1695_v13  ;;  %v1879_v13 = vld [vmem:[#allocation8 + $0x2d4] sm:$0xf0]  ;;  %v1299_v5 = vor.u32 %v1795_v60, %v1298_v59  ;;  %v1805_v59 = vld [vmem:[#allocation8 + $0x8c] sm:$0xf]  ;;  %v1348_v60 = vld [vmem:[#allocation8 + $0x98] sm:$0xf0] }
  0x60   :  { %1065 = vmatpush.bf16.msra.mxu0 %v1295_v4  ;;  %1078 = vmatpush.bf16.msra.mxu1 %v1423_v7  ;;  %v1811_v4 = vld [vmem:[#allocation8 + $0xb4] sm:$0xf0] }
  0x61   :  { %v1363_v11 = vor.u32 %v1811_v4, %v1362_v3  ;;  %v1698_v3 = vld [vmem:[#allocation8 + $0x348] sm:$0xf]  ;;  %v1895_v4 = vld [vmem:[#allocation8 + $0x354] sm:$0xf0] }
  0x62   :  { %1091 = vmatpush.bf16.msra.mxu2 %v1551_v22  ;;  %1104 = vmatpush.bf16.msra.mxu3 %v1679_v25  ;;  %v1839_v22 = vld [vmem:[#allocation8 + $0x194] sm:$0xf0]  ;;  %v1635_v25 = vor.u32 %v1879_v13, %v1634_v12  ;;  %v1396_v12 = vld [vmem:[#allocation8 + $0xf8] sm:$0xf0] }
  0x63   :  { %v1475_v29 = vor.u32 %v1839_v22, %v1474_v21  ;;  %v1682_v21 = vld [vmem:[#allocation8 + $0x328] sm:$0xf]  ;;  %v1891_v22 = vld [vmem:[#allocation8 + $0x334] sm:$0xf0] }
  0x64   :  { %1066 = vmatpush.bf16.msra.mxu0 %v1279_v17  ;;  %1079 = vmatpush.bf16.msra.mxu1 %v1407_v19  ;;  %v1762_v17 = vld [vmem:[#allocation8 + $0x3c8] sm:$0xf] }
  0x65   :  { %v1346_v19 = vld [vmem:[#allocation8 + $0x88] sm:$0xf]  ;;  %v1763_v26 = vor.u32 %v1911_v18, %v1762_v17  ;;  %v1849_v17 = vld [vmem:[#allocation8 + $0x1ec] sm:$0xf]  ;;  %v1524_v18 = vld [vmem:[#allocation8 + $0x1f8] sm:$0xf0] }
  0x66   :  { %1092 = vmatpush.bf16.msra.mxu2 %v1535_v28  ;;  %1105 = vmatpush.bf16.msra.mxu3 %v1663_v31  ;;  %v1347_v28 = vor.u32 %v1807_v20, %v1346_v19  ;;  %v1746_v31 = vld [vmem:[#allocation8 + $0x3a8] sm:$0xf]  ;;  %v1859_v20 = vld [vmem:[#allocation8 + $0x234] sm:$0xf0] }
  0x67   :  { %v1554_v19 = vld [vmem:[#allocation8 + $0x228] sm:$0xf] }
  0x68   :  { %v1555_v30 = vor.u32 %v1859_v20, %v1554_v19 }
  0xa4   :  { %v178_v35 = vpop.f32.mrf.mxu0  ;;  %v191_v36 = vpop.f32.mrf.mxu1 }
  0xa5   :  { %v179_v38 = vadd.f32 %v178_v35, %v111_v33  ;;  %v192_v39 = vadd.f32 %v191_v36, %v112_v34  ;;  %v1330_v33 = vld [vmem:[#allocation8 + $0x68] sm:$0xf]  ;;  %v1803_v34 = vld [vmem:[#allocation8 + $0x74] sm:$0xf0] }
  0xa6   :  { %v1458_v35 = vld [vmem:[#allocation8 + $0x168] sm:$0xf]  ;;  %v1835_v36 = vld [vmem:[#allocation8 + $0x174] sm:$0xf0] }
  0xa7   :  { %v221_v43 = vmax.f32 %v179_v38, 0.0  ;;  %v222_v44 = vmax.f32 %v192_v39, 0.0  ;;  %v1747_v38 = vor.u32 %v1907_v32, %v1746_v31  ;;  %v1602_v39 = vld [vmem:[#allocation8 + $0x288] sm:$0xf]  ;;  %v1683_v31 = vor.u32 %v1891_v22, %v1682_v21  ;;  %v1508_v32 = vld [vmem:[#allocation8 + $0x1d8] sm:$0xf0] }
  0xa8   :  { %v1603_v49 = vor.u32 %v1871_v40, %v1602_v39  ;;  %v1913_v39 = vld [vmem:[#allocation8 + $0x3ec] sm:$0xf]  ;;  %v1780_v40 = vld [vmem:[#allocation8 + $0x3f8] sm:$0xf0] }
  0xa9   :  { %v2121_v51 = vpack.c.bf16 %v221_v43, %v221_v43  ;;  %v2123_v52 = vpack.c.bf16 %v222_v44, %v222_v44  ;;  %v1331_v43 = vor.u32 %v1803_v34, %v1330_v33  ;;  %v1459_v44 = vor.u32 %v1835_v36, %v1458_v35  ;;  %v1538_v33 = vld [vmem:[#allocation8 + $0x208] sm:$0xf]  ;;  %v1855_v34 = vld [vmem:[#allocation8 + $0x214] sm:$0xf0]  ;;  %v1797_v21 = vld [vmem:[#allocation8 + $0x4c] sm:$0xf] }
  0xaa   :  { %v1666_v35 = vld [vmem:[#allocation8 + $0x308] sm:$0xf]  ;;  %v1887_v36 = vld [vmem:[#allocation8 + $0x314] sm:$0xf0]  ;;  %v1316_v22 = vld [vmem:[#allocation8 + $0x58] sm:$0xf0] }
  0xab   :  { %1015 = vmatmul.bf16.vlgmr.msrb.gmra.mxu0 %v2121_v51  ;;  %1028 = vmatmul.bf16.vlgmr.msrb.gmra.mxu1 %v2123_v52 }
  0xac   :  { %v204_v55 = vpop.f32.mrf.mxu2  ;;  %v217_v56 = vpop.f32.mrf.mxu3  ;;  %1111 = vmatpush.bf16.msrb.mxu0 %v1395_v47  ;;  %1124 = vmatpush.bf16.msrb.mxu1 %v1523_v48  ;;  %v1442_v47 = vld [vmem:[#allocation8 + $0x148] sm:$0xf]  ;;  %v1831_v48 = vld [vmem:[#allocation8 + $0x154] sm:$0xf0] }
  0xad   :  { %v205_v61 = vadd.f32 %v204_v55, %v113_v45  ;;  %v218_v62 = vadd.f32 %v217_v56, %v114_v46  ;;  %v180_v63 = vpop.f32.mrf.mxu0  ;;  %v193_v0 = vpop.f32.mrf.mxu1  ;;  %v1314_v45 = vld [vmem:[#allocation8 + $0x48] sm:$0xf]  ;;  %v1799_v46 = vld [vmem:[#allocation8 + $0x54] sm:$0xf0]  ;;  %v1443_v58 = vor.u32 %v1831_v48, %v1442_v47  ;;  %v1841_v47 = vld [vmem:[#allocation8 + $0x1ac] sm:$0xf] }
  0xae   :  { %v1714_v55 = vld [vmem:[#allocation8 + $0x368] sm:$0xf]  ;;  %v1899_v56 = vld [vmem:[#allocation8 + $0x374] sm:$0xf0]  ;;  %v1587_v63 = vor.u32 %v1867_v54, %v1586_v53  ;;  %v1492_v48 = vld [vmem:[#allocation8 + $0x1b8] sm:$0xf0] }
  0xaf   :  { %v223_v7 = vmax.f32 %v205_v61, 0.0  ;;  %v224_v8 = vmax.f32 %v218_v62, 0.0  ;;  %v1426_v61 = vld [vmem:[#allocation8 + $0x128] sm:$0xf]  ;;  %v1827_v62 = vld [vmem:[#allocation8 + $0x134] sm:$0xf0]  ;;  %v1715_v0 = vor.u32 %v1899_v56, %v1714_v55 }
  0xb0   :  { %1112 = vmatpush.bf16.msrb.mxu0 %v1379_v57  ;;  %1125 = vmatpush.bf16.msrb.mxu1 %v1507_v1  ;;  %v1315_v57 = vor.u32 %v1799_v46, %v1314_v45  ;;  %v1570_v1 = vld [vmem:[#allocation8 + $0x248] sm:$0xf]  ;;  %v1427_v6 = vor.u32 %v1827_v62, %v1426_v61  ;;  %v1667_v45 = vor.u32 %v1887_v36, %v1666_v35  ;;  %v1364_v46 = vld [vmem:[#allocation8 + $0xb8] sm:$0xf0]  ;;  %v1877_v53 = vld [vmem:[#allocation8 + $0x2cc] sm:$0xf] }
  0xb1   :  { %v2127_v14 = vpack.c.bf16 %v223_v7, %v223_v7  ;;  %v2129_v15 = vpack.c.bf16 %v224_v8, %v224_v8  ;;  %v1282_v7 = vld [vmem:[#allocation8 + $0x8] sm:$0xf]  ;;  %v1791_v8 = vld [vmem:[#allocation8 + $0x14] sm:$0xf0]  ;;  %v1571_v13 = vor.u32 %v1863_v2, %v1570_v1  ;;  %v1636_v54 = vld [vmem:[#allocation8 + $0x2d8] sm:$0xf0] }
  0xb2   :  { %v1909_v55 = vld [vmem:[#allocation8 + $0x3cc] sm:$0xf]  ;;  %v1764_v56 = vld [vmem:[#allocation8 + $0x3d8] sm:$0xf0] }
  0xb3   :  { %1041 = vmatmul.bf16.vlgmr.msrb.gmra.mxu2 %v2127_v14  ;;  %1054 = vmatmul.bf16.vlgmr.msrb.gmra.mxu3 %v2129_v15  ;;  %v1837_v61 = vld [vmem:[#allocation8 + $0x18c] sm:$0xf]  ;;  %v1476_v62 = vld [vmem:[#allocation8 + $0x198] sm:$0xf0] }
  0xb4   :  { %1137 = vmatpush.bf16.msrb.mxu2 %v1651_v9  ;;  %1150 = vmatpush.bf16.msrb.mxu3 %v1779_v10  ;;  %v206_v23 = vpop.f32.mrf.mxu2  ;;  %v219_v24 = vpop.f32.mrf.mxu3  ;;  %v1410_v9 = vld [vmem:[#allocation8 + $0x108] sm:$0xf]  ;;  %v1823_v10 = vld [vmem:[#allocation8 + $0x114] sm:$0xf0]  ;;  %v1873_v1 = vld [vmem:[#allocation8 + $0x2ac] sm:$0xf] }
  0xb5   :  { %1113 = vmatpush.bf16.msrb.mxu0 %v1363_v11  ;;  %1126 = vmatpush.bf16.msrb.mxu1 %v1491_v16  ;;  %v1817_v11 = vld [vmem:[#allocation8 + $0xec] sm:$0xf]  ;;  %v1699_v16 = vor.u32 %v1895_v4, %v1698_v3  ;;  %v1283_v23 = vor.u32 %v1791_v8, %v1282_v7  ;;  %v1411_v24 = vor.u32 %v1823_v10, %v1410_v9  ;;  %v1620_v2 = vld [vmem:[#allocation8 + $0x2b8] sm:$0xf0] }
  0xb6   :  { %v1905_v3 = vld [vmem:[#allocation8 + $0x3ac] sm:$0xf]  ;;  %v1748_v4 = vld [vmem:[#allocation8 + $0x3b8] sm:$0xf0] }
  0xb7   :  { %v1801_v7 = vld [vmem:[#allocation8 + $0x6c] sm:$0xf]  ;;  %v1332_v8 = vld [vmem:[#allocation8 + $0x78] sm:$0xf0] }
  0xb8   :  { %1138 = vmatpush.bf16.msrb.mxu2 %v1635_v25  ;;  %1151 = vmatpush.bf16.msrb.mxu3 %v1763_v26  ;;  %v1399_v25 = vor.u32 %v1817_v11, %v1396_v12  ;;  %v1527_v26 = vor.u32 %v1849_v17, %v1524_v18  ;;  %v1833_v9 = vld [vmem:[#allocation8 + $0x16c] sm:$0xf]  ;;  %v1460_v10 = vld [vmem:[#allocation8 + $0x178] sm:$0xf0]  ;;  %v1623_v11 = vor.u32 %v1873_v1, %v1620_v2 }
  0xb9   :  { %1114 = vmatpush.bf16.msrb.mxu0 %v1347_v28  ;;  %1127 = vmatpush.bf16.msrb.mxu1 %v1475_v29  ;;  %v1380_v28 = vld [vmem:[#allocation8 + $0xd8] sm:$0xf0]  ;;  %v1845_v29 = vld [vmem:[#allocation8 + $0x1cc] sm:$0xf]  ;;  %v1751_v12 = vor.u32 %v1905_v3, %v1748_v4  ;;  %v1335_v19 = vor.u32 %v1801_v7, %v1332_v8  ;;  %v1463_v20 = vor.u32 %v1833_v9, %v1460_v10  ;;  %v357_v3 = vld [vmem:[%s2155_s4] sm:$0xf] }
  0xba   :  { %v1383_v41 = vor.u32 %v1813_v27, %v1380_v28  ;;  %v1511_v42 = vor.u32 %v1845_v29, %v1508_v32  ;;  %v1901_v17 = vld [vmem:[#allocation8 + $0x38c] sm:$0xf]  ;;  %v1732_v18 = vld [vmem:[#allocation8 + $0x398] sm:$0xf0]  ;;  %v359_v4 = vperm.slane %v357_v3, 0 }
  0xbb   :  { %1067 = vmatmul.bf16.vlgmr.msra.gmra.mxu0 %v2121_v51  ;;  %1080 = vmatmul.bf16.vlgmr.msra.gmra.mxu1 %v2123_v52  ;;  %v1865_v27 = vld [vmem:[#allocation8 + $0x26c] sm:$0xf]  ;;  %v1588_v28 = vld [vmem:[#allocation8 + $0x278] sm:$0xf0] }
  0xbc   :  { %1139 = vmatpush.bf16.msrb.mxu2 %v1619_v37  ;;  %1152 = vmatpush.bf16.msrb.mxu3 %v1747_v38  ;;  %v1881_v37 = vld [vmem:[#allocation8 + $0x2ec] sm:$0xf]  ;;  %v1652_v38 = vld [vmem:[#allocation8 + $0x2f8] sm:$0xf0] }
  0xbd   :  { %1115 = vmatpush.bf16.msrb.mxu0 %v1331_v43  ;;  %1128 = vmatpush.bf16.msrb.mxu1 %v1459_v44  ;;  %v1809_v43 = vld [vmem:[#allocation8 + $0xac] sm:$0xf]  ;;  %v1539_v44 = vor.u32 %v1855_v34, %v1538_v33  ;;  %v1300_v34 = vld [vmem:[#allocation8 + $0x38] sm:$0xf0] }
  0xbe   :  { %v1897_v29 = vld [vmem:[#allocation8 + $0x36c] sm:$0xf]  ;;  %v1428_v36 = vld [vmem:[#allocation8 + $0x138] sm:$0xf0] }
  0xbf   :  { %v1793_v33 = vld [vmem:[#allocation8 + $0x2c] sm:$0xf] }
  0xc0   :  { %1140 = vmatpush.bf16.msrb.mxu2 %v1603_v49  ;;  %1153 = vmatpush.bf16.msrb.mxu3 %v1731_v50  ;;  %v1655_v49 = vor.u32 %v1881_v37, %v1652_v38  ;;  %v1783_v50 = vor.u32 %v1913_v39, %v1780_v40  ;;  %v1825_v35 = vld [vmem:[#allocation8 + $0x12c] sm:$0xf]  ;;  %v1591_v37 = vor.u32 %v1865_v27, %v1588_v28  ;;  %v1572_v40 = vld [vmem:[#allocation8 + $0x258] sm:$0xf0]  ;;  %v360_v27 = vperm.slane %v357_v3, 1 }
  0xc1   :  { %1116 = vmatpush.bf16.msrb.mxu0 %v1315_v57  ;;  %1129 = vmatpush.bf16.msrb.mxu1 %v1443_v58  ;;  %v1367_v57 = vor.u32 %v1809_v43, %v1364_v46  ;;  %v1495_v58 = vor.u32 %v1841_v47, %v1492_v48  ;;  %v1861_v39 = vld [vmem:[#allocation8 + $0x24c] sm:$0xf]  ;;  %v1303_v43 = vor.u32 %v1793_v33, %v1300_v34  ;;  %v1284_v46 = vld [vmem:[#allocation8 + $0x18] sm:$0xf0] }
  0xc2   :  { %v1821_v47 = vld [vmem:[#allocation8 + $0x10c] sm:$0xf]  ;;  %v1412_v48 = vld [vmem:[#allocation8 + $0x118] sm:$0xf0] }
  0xc3   :  { %1093 = vmatmul.bf16.vlgmr.msra.gmra.mxu2 %v2127_v14  ;;  %1106 = vmatmul.bf16.vlgmr.msra.gmra.mxu3 %v2129_v15 }
  0xc4   :  { %1141 = vmatpush.bf16.msrb.mxu2 %v1587_v63  ;;  %1154 = vmatpush.bf16.msrb.mxu3 %v1715_v0  ;;  %v1639_v63 = vor.u32 %v1877_v53, %v1636_v54  ;;  %v1767_v0 = vor.u32 %v1909_v55, %v1764_v56  ;;  %v1857_v53 = vld [vmem:[#allocation8 + $0x22c] sm:$0xf]  ;;  %v1556_v54 = vld [vmem:[#allocation8 + $0x238] sm:$0xf0] }
  0xc5   :  { %1117 = vmatpush.bf16.msrb.mxu0 %v1299_v5  ;;  %1130 = vmatpush.bf16.msrb.mxu1 %v1427_v6  ;;  %v1351_v5 = vor.u32 %v1805_v59, %v1348_v60  ;;  %v1479_v6 = vor.u32 %v1837_v61, %v1476_v62  ;;  %v1889_v55 = vld [vmem:[#allocation8 + $0x32c] sm:$0xf]  ;;  %v1684_v56 = vld [vmem:[#allocation8 + $0x338] sm:$0xf0]  ;;  %v1559_v59 = vor.u32 %v1857_v53, %v1556_v54 }
  0xc6   :  { %v1687_v60 = vor.u32 %v1889_v55, %v1684_v56  ;;  %v1853_v61 = vld [vmem:[#allocation8 + $0x20c] sm:$0xf]  ;;  %v1540_v62 = vld [vmem:[#allocation8 + $0x218] sm:$0xf0] }
  0xc7   :  { %v1543_v1 = vor.u32 %v1853_v61, %v1540_v62 }
  0xc8   :  { %1142 = vmatpush.bf16.msrb.mxu2 %v1571_v13  ;;  %1155 = vmatpush.bf16.msrb.mxu3 %v1699_v16  ;;  %v1869_v13 = vld [vmem:[#allocation8 + $0x28c] sm:$0xf]  ;;  %v1604_v16 = vld [vmem:[#allocation8 + $0x298] sm:$0xf0] }
  0xc9   :  { %1118 = vmatpush.bf16.msrb.mxu0 %v1283_v23  ;;  %1131 = vmatpush.bf16.msrb.mxu1 %v1411_v24  ;;  %v1829_v23 = vld [vmem:[#allocation8 + $0x14c] sm:$0xf]  ;;  %v1444_v24 = vld [vmem:[#allocation8 + $0x158] sm:$0xf0] }
  0xca   :  { %v1447_v32 = vor.u32 %v1829_v23, %v1444_v24 }
  0xcc   :  { %1143 = vmatpush.bf16.msrb.mxu2 %v1555_v30  ;;  %1156 = vmatpush.bf16.msrb.mxu3 %v1683_v31  ;;  %v1716_v30 = vld [vmem:[#allocation8 + $0x378] sm:$0xf0]  ;;  %v1319_v31 = vor.u32 %v1797_v21, %v1316_v22 }
  0xcd   :  { %1163 = vmatpush.bf16.msra.mxu0 %v1399_v25  ;;  %1176 = vmatpush.bf16.msra.mxu1 %v1527_v26  ;;  %v1607_v25 = vor.u32 %v1869_v13, %v1604_v16  ;;  %v1735_v26 = vor.u32 %v1901_v17, %v1732_v18  ;;  %v1719_v38 = vor.u32 %v1897_v29, %v1716_v30  ;;  %v361_v30 = vperm.slane %v357_v3, 2 }
  0xce   :  { %1119 = vmatmul.bf16.vlgmr.msrb.gmra.mxu0 %v2121_v51  ;;  %1132 = vmatmul.bf16.vlgmr.msrb.gmra.mxu1 %v2123_v52 }
  0xd0   :  { %1144 = vmatpush.bf16.msrb.mxu2 %v1539_v44  ;;  %1157 = vmatpush.bf16.msrb.mxu3 %v1667_v45  ;;  %v1431_v44 = vor.u32 %v1825_v35, %v1428_v36  ;;  %v1789_v45 = vld [vmem:[#allocation8 + $0xc] sm:$0xf] }
  0xd1   :  { %1164 = vmatpush.bf16.msra.mxu0 %v1383_v41  ;;  %1177 = vmatpush.bf16.msra.mxu1 %v1511_v42  ;;  %v1893_v41 = vld [vmem:[#allocation8 + $0x34c] sm:$0xf]  ;;  %v1700_v42 = vld [vmem:[#allocation8 + $0x358] sm:$0xf0] }
  0xd3   :  { %1145 = vmatmul.bf16.vlgmr.msrb.gmra.mxu2 %v2127_v14  ;;  %1158 = vmatmul.bf16.vlgmr.msrb.gmra.mxu3 %v2129_v15 }
  0xd4   :  { %1189 = vmatpush.bf16.msra.mxu2 %v1655_v49  ;;  %1202 = vmatpush.bf16.msra.mxu3 %v1783_v50  ;;  %v1575_v49 = vor.u32 %v1861_v39, %v1572_v40  ;;  %v1703_v50 = vor.u32 %v1893_v41, %v1700_v42  ;;  %v362_v40 = vperm.slane %v357_v3, 3 }
  0xd5   :  { %1165 = vmatpush.bf16.msra.mxu0 %v1367_v57  ;;  %1178 = vmatpush.bf16.msra.mxu1 %v1495_v58  ;;  %v1287_v57 = vor.u32 %v1789_v45, %v1284_v46  ;;  %v1415_v58 = vor.u32 %v1821_v47, %v1412_v48 }
  0xd8   :  { %1190 = vmatpush.bf16.msra.mxu2 %v1639_v63  ;;  %1203 = vmatpush.bf16.msra.mxu3 %v1767_v0  ;;  %v1885_v63 = vld [vmem:[#allocation8 + $0x30c] sm:$0xf]  ;;  %v1668_v0 = vld [vmem:[#allocation8 + $0x318] sm:$0xf0] }
  0xd9   :  { %1166 = vmatpush.bf16.msra.mxu0 %v1351_v5  ;;  %1179 = vmatpush.bf16.msra.mxu1 %v1479_v6  ;;  %v1671_v2 = vor.u32 %v1885_v63, %v1668_v0 }
  0xdc   :  { %1191 = vmatpush.bf16.msra.mxu2 %v1623_v11  ;;  %1204 = vmatpush.bf16.msra.mxu3 %v1751_v12 }
  0xdd   :  { %1167 = vmatpush.bf16.msra.mxu0 %v1335_v19  ;;  %1180 = vmatpush.bf16.msra.mxu1 %v1463_v20 }
  0xe0   :  { %1192 = vmatpush.bf16.msra.mxu2 %v1607_v25  ;;  %1205 = vmatpush.bf16.msra.mxu3 %v1735_v26 }
  0xe1   :  { %1168 = vmatpush.bf16.msra.mxu0 %v1319_v31  ;;  %1181 = vmatpush.bf16.msra.mxu1 %v1447_v32 }
  0xe4   :  { %1193 = vmatpush.bf16.msra.mxu2 %v1591_v37  ;;  %1206 = vmatpush.bf16.msra.mxu3 %v1719_v38 }
  0xe5   :  { %1169 = vmatpush.bf16.msra.mxu0 %v1303_v43  ;;  %1182 = vmatpush.bf16.msra.mxu1 %v1431_v44  ;;  %v1219_v43 = vld [vmem:[#allocation10] sm:$0xf] }
  0xe6   :  { %v1223_v55 = vperm.slane %v1219_v43, 2  ;;  %v1224_v0 = vperm.slane %v1219_v43, 3 }
  0xe8   :  { %1194 = vmatpush.bf16.msra.mxu2 %v1575_v49  ;;  %1207 = vmatpush.bf16.msra.mxu3 %v1703_v50  ;;  %v1222_v49 = vperm.slane %v1219_v43, 1  ;;  %v1221_v50 = vperm.slane %v1219_v43, 0 }
  0xe9   :  { %1170 = vmatpush.bf16.msra.mxu0 %v1287_v57  ;;  %1183 = vmatpush.bf16.msra.mxu1 %v1415_v58 }
  0xec   :  { %1195 = vmatpush.bf16.msra.mxu2 %v1559_v59  ;;  %1208 = vmatpush.bf16.msra.mxu3 %v1687_v60 }
  0xed   :  { %1171 = vmatmul.bf16.vlgmr.msra.gmra.mxu0 %v2121_v51  ;;  %1184 = vmatmul.bf16.vlgmr.msra.gmra.mxu1 %v2123_v52 }
  0xf0   :  { %1196 = vmatpush.bf16.msra.mxu2 %v1543_v1  ;;  %1209 = vmatpush.bf16.msra.mxu3 %v1671_v2 }
  0xf3   :  { %1197 = vmatmul.bf16.vlgmr.msra.gmra.mxu2 %v2127_v14  ;;  %1210 = vmatmul.bf16.vlgmr.msra.gmra.mxu3 %v2129_v15 }
 0x128   :  { %v1016_v5 = vpop.f32.mrf.mxu0  ;;  %v1029_v6 = vpop.f32.mrf.mxu1 }
 0x129   :  { %v1017_v7 = vadd.f32 %v1016_v5, %v359_v4 }
 0x12b   :  { %v1030_v8 = vadd.f32 %v1029_v6, %v1017_v7 }
 0x130   :  { %v1018_v9 = vpop.f32.mrf.mxu0  ;;  %v1031_v10 = vpop.f32.mrf.mxu1 }
 0x136   :  { %v1042_v51 = vpop.f32.mrf.mxu2  ;;  %v1055_v11 = vpop.f32.mrf.mxu3 }
 0x137   :  { %v1043_v38 = vadd.f32 %v1042_v51, %v1030_v8  ;;  %v1924_v8 = vld [vmem:[#allocation2] ss:$0 sm:$0xff] }
 0x138   :  { %v1068_v52 = vpop.f32.mrf.mxu0  ;;  %v1081_v12 = vpop.f32.mrf.mxu1 }
 0x139   :  { %v1069_v31 = vadd.f32 %v1068_v52, %v360_v27  ;;  %v1056_v42 = vadd.f32 %v1055_v11, %v1043_v38 }
 0x13b   :  { %v1082_v33 = vadd.f32 %v1081_v12, %v1069_v31  ;;  %v1215_v53 = vmax.f32 %v1056_v42, 0.0 }
 0x13d   :  { %v1229_v61 = vmul.f32 %v1221_v50, %v1215_v53 }
 0x13e   :  { %v1044_v13 = vpop.f32.mrf.mxu2  ;;  %v1057_v16 = vpop.f32.mrf.mxu3 }
 0x140   :  { %v1070_v14 = vpop.f32.mrf.mxu0  ;;  %v1083_v17 = vpop.f32.mrf.mxu1 }
 0x146   :  { %v1094_v15 = vpop.f32.mrf.mxu2  ;;  %v1107_v18 = vpop.f32.mrf.mxu3 }
 0x147   :  { %v1095_v36 = vadd.f32 %v1094_v15, %v1082_v33 }
 0x149   :  { %v1108_v41 = vadd.f32 %v1107_v18, %v1095_v36 }
 0x14b   :  { %v1120_v19 = vpop.f32.mrf.mxu0  ;;  %v1133_v20 = vpop.f32.mrf.mxu1  ;;  %v1216_v48 = vmax.f32 %v1108_v41, 0.0 }
 0x14c   :  { %v1121_v32 = vadd.f32 %v1120_v19, %v361_v30 }
 0x14d   :  { %v1230_v59 = vmul.f32 %v1222_v49, %v1216_v48 }
 0x14e   :  { %v1096_v21 = vpop.f32.mrf.mxu2  ;;  %v1109_v22 = vpop.f32.mrf.mxu3  ;;  %v1134_v37 = vadd.f32 %v1133_v20, %v1121_v32 }
 0x14f   :  { %v1233_v2 = vadd.f32 %v1230_v59, %v1229_v61 }
 0x153   :  { %v1122_v23 = vpop.f32.mrf.mxu0  ;;  %v1135_v24 = vpop.f32.mrf.mxu1 }
 0x156   :  { %v1146_v25 = vpop.f32.mrf.mxu2  ;;  %v1159_v26 = vpop.f32.mrf.mxu3 }
 0x157   :  { %v1147_v39 = vadd.f32 %v1146_v25, %v1134_v37 }
 0x159   :  { %v1160_v44 = vadd.f32 %v1159_v26, %v1147_v39 }
 0x15b   :  { %v1217_v54 = vmax.f32 %v1160_v44, 0.0 }
 0x15d   :  { %v1231_v62 = vmul.f32 %v1223_v55, %v1217_v54 }
 0x15e   :  { %v1148_v28 = vpop.f32.mrf.mxu2  ;;  %v1161_v29 = vpop.f32.mrf.mxu3 }
 0x15f   :  { %v1234_v4 = vadd.f32 %v1233_v2, %v1231_v62 }
 0x16a   :  { %v1172_v34 = vpop.f32.mrf.mxu0  ;;  %v1185_v35 = vpop.f32.mrf.mxu1 }
 0x16b   :  { %v1173_v45 = vadd.f32 %v1172_v34, %v362_v40 }
 0x16d   :  { %v1186_v56 = vadd.f32 %v1185_v35, %v1173_v45 }
 0x172   :  { %v1174_v46 = vpop.f32.mrf.mxu0  ;;  %v1187_v47 = vpop.f32.mrf.mxu1 }
 0x176   :  { %v1198_v57 = vpop.f32.mrf.mxu2  ;;  %v1211_v58 = vpop.f32.mrf.mxu3 }
 0x177   :  { %v1199_v60 = vadd.f32 %v1198_v57, %v1186_v56 }
 0x179   :  { %v1212_v63 = vadd.f32 %v1211_v58, %v1199_v60 }
 0x17b   :  { %v1218_v1 = vmax.f32 %v1212_v63, 0.0 }
 0x17d   :  { %v1232_v3 = vmul.f32 %v1224_v0, %v1218_v1 }
 0x17e   :  { %v1200_v5 = vpop.f32.mrf.mxu2  ;;  %v1213_v6 = vpop.f32.mrf.mxu3 }
 0x17f   :  { %v1235_v7 = vadd.f32 %v1234_v4, %v1232_v3 }
 0x181   :  { %1236 = vadd.xlane.f32.xlu0 %v1235_v7 }
 0x1f4   :  { %v1237_v9 = vpop.xlane.xlu0 %1236 }
 0x1f5   :  { %v1242_v10 = vadd.f32 %v1924_v8, %v1237_v9 }
 0x1f7   :  { %1244 = vst.msk [vmem:[%s2158_s7] sm:$0xff] %vm1243_vm3, %v1242_v10 }
 0x1f8   :  { %1249 = vsyncpa [#allocation4], 1 }
 0x1f9   :  { %1250 = vsyncpa [#allocation6], 1 }
 0x1fa   :  { %1251 = vsyncpa [#allocation9], 1 }

</bundles_post_ra>
